<compile_context>
chip_gen: v7x
topology: tpu7x:2x2x1
jax: 0.10.0
libtpu: 0.0.40
codegen_flags: <defaults>
</compile_context>

<pallas_src>
import functools

import numpy as np
import jax
import jax.numpy as jnp
from jax import lax
from jax.experimental import pallas as pl
from jax.experimental.pallas import tpu as pltpu

EPS = 1e-5


def _resnet_block_kernel(dims, use_bn, use_skip, *refs):
    """All refs in VMEM.

    Layout: activations are (rows, lanes) = (H, L) with L = N*W*C and lane
    index = n*(W*C) + w*C + c.  Stacked conv inputs are (H, k*L) bf16; stacked
    weights are (k*L, L) bf16 with the W zero-padding folded in
    (block-diagonal over the batch fold).
    """
    N, H, W, C, k = dims
    p = (k - 1) // 2
    L = N * W * C
    G = N * W                       # lane groups per channel

    out_ref = refs[-1]
    refs = refs[:-1]
    if use_skip:
        xskip_ref = refs[-1]
        refs = refs[:-1]
    if use_bn:
        x1_ref, w1_ref, g1_ref, be1_ref, w2_ref, g2_ref, be2_ref = refs
    else:
        x1_ref, w1_ref, b1_ref, w2_ref, b2_ref = refs

    def fold_groups(stats):
        # Per-channel all-reduce across the G lane groups of width C.  When G
        # is a power of two this is a log2(G) XLU roll+add tree; every lane
        # ends up holding its channel's total, so no broadcast-back is needed.
        if G & (G - 1) == 0:
            shift = C
            while shift < L:
                stats = stats + pltpu.roll(stats, shift, axis=1)
                shift *= 2
            return stats
        # Fallback for non power-of-two group counts (not traced at toy shapes).
        s = jnp.sum(stats.reshape(2, G, C), axis=1)
        return jnp.tile(s, (1, G))

    def batchnorm(y, g_ref, be_ref):
        # Train-mode BN (biased variance), one-pass sum / sum-of-squares.
        s1 = jnp.sum(y, axis=0, keepdims=True)
        s2 = jnp.sum(y * y, axis=0, keepdims=True)
        stats = fold_groups(jnp.concatenate([s1, s2], axis=0))   # (2, L)
        inv_n = 1.0 / (H * G)
        mean = stats[0:1, :] * inv_n
        var = stats[1:2, :] * inv_n - mean * mean
        scale = g_ref[...] * lax.rsqrt(var + EPS)
        shift = be_ref[...] - mean * scale
        return y * scale + shift

    # --- conv1 (+bn1) -> relu : single K = k*L MXU push ----------------------
    y = jnp.dot(x1_ref[...], w1_ref[...], preferred_element_type=jnp.float32)
    if use_bn:
        y = batchnorm(y, g1_ref, be1_ref)
    else:
        y = y + b1_ref[...]
    y = jnp.maximum(y, 0.0)

    # --- stage relu(y1) for conv2: cast to bf16 once, pad H, lane-stack ------
    yb = y.astype(jnp.bfloat16)
    if p > 0:
        zrow = jnp.zeros((p, L), jnp.bfloat16)
        ypad = jnp.concatenate([zrow, yb, zrow], axis=0)          # (H + 2p, L)
    else:
        ypad = yb
    if k > 1:
        x2 = jnp.concatenate([ypad[dh:dh + H, :] for dh in range(k)], axis=1)
    else:
        x2 = ypad

    # --- conv2 (+bn2) -> (+skip) -> relu : single K = k*L MXU push -----------
    y = jnp.dot(x2, w2_ref[...], preferred_element_type=jnp.float32)
    if use_bn:
        y = batchnorm(y, g2_ref, be2_ref)
    else:
        y = y + b2_ref[...]
    if use_skip:
        y = y + xskip_ref[...]
    out_ref[...] = jnp.maximum(y, 0.0)                            # (H, L) lane-dense


def _build_stacked_weights(wt, k, C, W, N):
    """PyTorch conv weight (Cout, Cin, kh, kw) -> K-stacked banded (k*L, L)
    bf16, L = N*W*C.

    The W "same" zero-padding is folded in (out-of-range horizontal taps are
    simply absent) and the batch fold is block-diagonal, so one matmul per
    conv fuses the k*k taps and the channel contraction.
    """
    wt = np.asarray(jax.device_get(wt), np.float32)   # (Cout, Cin, kh, kw)
    p = (k - 1) // 2
    WC = W * C
    L = N * WC
    B = np.zeros((k, L, L), np.float32)
    for dh in range(k):
        for dw in range(k):
            blk = wt[:, :, dh, dw].T                  # (Cin, Cout)
            for wo in range(W):
                wi = wo + dw - p
                if not 0 <= wi < W:
                    continue                          # W padding folded into weights
                for n in range(N):
                    r = n * WC + wi * C
                    c = n * WC + wo * C
                    B[dh, r:r + C, c:c + C] = blk
    return jnp.asarray(B.reshape(k * L, L), jnp.bfloat16)


def resnet_block(x_nchw, params, kernel_size,
                 skip_connections=True, batch_normalization=True):
    """PyTorch-compatible entry point: NCHW in, NCHW out."""
    assert kernel_size % 2 == 1, "only odd ('same'-padding) kernel sizes"
    w1, b1, g1, be1, w2, b2, g2, be2 = params
    N, C, H, W = x_nchw.shape
    k = kernel_size
    p = (k - 1) // 2
    L = N * W * C

    # NCHW -> lane-folded (H, L) rows x lanes, lane index = n*W*C + w*C + c.
    x_rows = jnp.transpose(x_nchw, (2, 0, 3, 1)).reshape(H, L).astype(jnp.float32)
    # Pad H (rows) and lane-stack the k row taps for conv1; bf16 conv path.
    x_pad = jnp.pad(x_rows, ((p, p), (0, 0))).astype(jnp.bfloat16)
    if k > 1:
        x1 = jnp.concatenate([x_pad[dh:dh + H, :] for dh in range(k)], axis=1)
    else:
        x1 = x_pad

    B1 = _build_stacked_weights(w1, k, C, W, N)
    B2 = _build_stacked_weights(w2, k, C, W, N)

    def lane_vec(v):  # (C,) -> (1, L), lane index = n*W*C + w*C + c
        return jnp.tile(jnp.asarray(v, jnp.float32).reshape(1, C), (1, N * W))

    if batch_normalization:
        # Conv biases dropped: train-mode batch-mean subtraction cancels them.
        operands = [x1, B1, lane_vec(g1), lane_vec(be1),
                    B2, lane_vec(g2), lane_vec(be2)]
    else:
        operands = [x1, B1, lane_vec(b1), B2, lane_vec(b2)]
    if skip_connections:
        operands.append(x_rows)   # small f32 copy used only for the skip add

    kernel = functools.partial(_resnet_block_kernel, (N, H, W, C, k),
                               batch_normalization, skip_connections)
    vmem = pl.BlockSpec(memory_space=pltpu.MemorySpace.VMEM)

    y = pl.pallas_call(
        kernel,
        out_shape=jax.ShapeDtypeStruct((H, L), jnp.float32),
        in_specs=[vmem] * len(operands),
        out_specs=vmem,
        compiler_params=pltpu.CompilerParams(vmem_limit_bytes=32 * 1024 * 1024),
    )(*operands)

    # (H, L) -> NCHW
    return jnp.transpose(y.reshape(H, N, W, C), (1, 3, 0, 2))


def resnet_block_reference(x_nchw, params, kernel_size,
                           skip_connections=True, batch_normalization=True):
    """Pure-JAX f32 reference (mirrors the PyTorch forward) for verification."""
    w1, b1, g1, be1, w2, b2, g2, be2 = params
    p = (kernel_size - 1) // 2

    def conv(x, w, b):
        y = lax.conv_general_dilated(
            x, w, window_strides=(1, 1), padding=[(p, p), (p, p)],
            dimension_numbers=("NCHW", "OIHW", "NCHW"),
            precision=lax.Precision.HIGHEST)
        return y + b.reshape(1, -1, 1, 1)

    def bnorm(y, g, be):
        mean = jnp.mean(y, axis=(0, 2, 3), keepdims=True)
        var = jnp.mean((y - mean) ** 2, axis=(0, 2, 3), keepdims=True)
        return ((y - mean) * lax.rsqrt(var + EPS)
                * g.reshape(1, -1, 1, 1) + be.reshape(1, -1, 1, 1))

    y = conv(x_nchw, w1, b1)
    if batch_normalization:
        y = bnorm(y, g1, be1)
    y = jnp.maximum(y, 0.0)
    y = conv(y, w2, b2)
    if batch_normalization:
        y = bnorm(y, g2, be2)
    if skip_connections:
        y = y + x_nchw
    return jnp.maximum(y, 0.0)


if __name__ == "__main__":
    N, C, H, W = 2, 4, 16, 16
    K = 3  # kernel_size

    key = jax.random.PRNGKey(0)
    keys = jax.random.split(key, 9)
    x = jax.random.normal(keys[0], (N, C, H, W), jnp.float32)

    # deterministic synthetic parameters (shapes from nn.Conv2d / nn.BatchNorm2d)
    w1 = 0.2 * jax.random.normal(keys[1], (C, C, K, K), jnp.float32)
    b1 = 0.1 * jax.random.normal(keys[2], (C,), jnp.float32)
    g1 = 1.0 + 0.1 * jax.random.normal(keys[3], (C,), jnp.float32)
    be1 = 0.1 * jax.random.normal(keys[4], (C,), jnp.float32)
    w2 = 0.2 * jax.random.normal(keys[5], (C, C, K, K), jnp.float32)
    b2 = 0.1 * jax.random.normal(keys[6], (C,), jnp.float32)
    g2 = 1.0 + 0.1 * jax.random.normal(keys[7], (C,), jnp.float32)
    be2 = 0.1 * jax.random.normal(keys[8], (C,), jnp.float32)
    params = (w1, b1, g1, be1, w2, b2, g2, be2)

    # bf16 MXU matmuls vs. an f32 HIGHEST reference -> relaxed tolerance.
    for skip in (True, False):
        for bn in (True, False):
            out = resnet_block(x, params, K, skip_connections=skip,
                               batch_normalization=bn)
            out = jax.block_until_ready(out)
            ref = resnet_block_reference(x, params, K, skip_connections=skip,
                                         batch_normalization=bn)
            ref = jax.block_until_ready(ref)
            assert out.shape == (N, C, H, W), out.shape
            max_err = float(jnp.max(jnp.abs(out - ref)))
            assert jnp.allclose(out, ref, atol=2e-2, rtol=2e-2), (skip, bn, max_err)

    print("KERNEL_OK")
</pallas_src>

<mosaic_0001>
module attributes {stable_mosaic.version = 11 : i64} {
  func.func @_resnet_block_kernel(%arg0: memref<16x384xbf16, #tpu.memory_space<vmem>>, %arg1: memref<384x128xbf16, #tpu.memory_space<vmem>>, %arg2: memref<1x128xf32, #tpu.memory_space<vmem>>, %arg3: memref<1x128xf32, #tpu.memory_space<vmem>>, %arg4: memref<384x128xbf16, #tpu.memory_space<vmem>>, %arg5: memref<1x128xf32, #tpu.memory_space<vmem>>, %arg6: memref<1x128xf32, #tpu.memory_space<vmem>>, %arg7: memref<16x128xf32, #tpu.memory_space<vmem>>, %arg8: memref<16x128xf32, #tpu.memory_space<vmem>>) attributes {dimension_semantics = [], scalar_prefetch = 0 : i64, scratch_operands = 0 : i64, tpu.core_type = #tpu.core_type<tc>} {
    %c0 = arith.constant 0 : index
    %c0_0 = arith.constant 0 : index
    %0 = vector.load %arg0[%c0, %c0_0] : memref<16x384xbf16, #tpu.memory_space<vmem>>, vector<16x384xbf16>
    %c0_1 = arith.constant 0 : index
    %c0_2 = arith.constant 0 : index
    %1 = vector.load %arg1[%c0_1, %c0_2] : memref<384x128xbf16, #tpu.memory_space<vmem>>, vector<384x128xbf16>
    %cst = arith.constant dense<0.000000e+00> : vector<16x128xf32>
    %2 = tpu.matmul %0, %1, %cst {dimension_numbers = #tpu.dot_dimension_numbers<[1], [0], [0], [1], [0, 0, 1, 1], [], []>} : vector<16x384xbf16>, vector<384x128xbf16>, vector<16x128xf32> -> vector<16x128xf32>
    %cst_3 = arith.constant dense<0.000000e+00> : vector<128xf32>
    %3 = vector.multi_reduction <add>, %2, %cst_3 [0] : vector<16x128xf32> to vector<128xf32>
    %4 = vector.shape_cast %3 : vector<128xf32> to vector<1x128xf32>
    %5 = arith.mulf %2, %2 : vector<16x128xf32>
    %cst_4 = arith.constant dense<0.000000e+00> : vector<128xf32>
    %6 = vector.multi_reduction <add>, %5, %cst_4 [0] : vector<16x128xf32> to vector<128xf32>
    %7 = vector.shape_cast %6 : vector<128xf32> to vector<1x128xf32>
    %8 = tpu.concatenate %4, %7 in 0 : vector<1x128xf32>, vector<1x128xf32> -> vector<2x128xf32>
    %c4_i32 = arith.constant 4 : i32
    %9 = tpu.dynamic_rotate %8 by %c4_i32 dim 1 : vector<2x128xf32>, i32 -> vector<2x128xf32>
    %10 = arith.addf %8, %9 : vector<2x128xf32>
    %c8_i32 = arith.constant 8 : i32
    %11 = tpu.dynamic_rotate %10 by %c8_i32 dim 1 : vector<2x128xf32>, i32 -> vector<2x128xf32>
    %12 = arith.addf %10, %11 : vector<2x128xf32>
    %c16_i32 = arith.constant 16 : i32
    %13 = tpu.dynamic_rotate %12 by %c16_i32 dim 1 : vector<2x128xf32>, i32 -> vector<2x128xf32>
    %14 = arith.addf %12, %13 : vector<2x128xf32>
    %c32_i32 = arith.constant 32 : i32
    %15 = tpu.dynamic_rotate %14 by %c32_i32 dim 1 : vector<2x128xf32>, i32 -> vector<2x128xf32>
    %16 = arith.addf %14, %15 : vector<2x128xf32>
    %c64_i32 = arith.constant 64 : i32
    %17 = tpu.dynamic_rotate %16 by %c64_i32 dim 1 : vector<2x128xf32>, i32 -> vector<2x128xf32>
    %18 = arith.addf %16, %17 : vector<2x128xf32>
    %19 = vector.extract_strided_slice %18 {offsets = [0, 0], sizes = [1, 128], strides = [1, 1]} : vector<2x128xf32> to vector<1x128xf32>
    %cst_5 = arith.constant 0.001953125 : f32
    %20 = vector.broadcast %cst_5 : f32 to vector<1x128xf32>
    %21 = arith.mulf %19, %20 : vector<1x128xf32>
    %22 = vector.extract_strided_slice %18 {offsets = [1, 0], sizes = [1, 128], strides = [1, 1]} : vector<2x128xf32> to vector<1x128xf32>
    %cst_6 = arith.constant 0.001953125 : f32
    %23 = vector.broadcast %cst_6 : f32 to vector<1x128xf32>
    %24 = arith.mulf %22, %23 : vector<1x128xf32>
    %25 = arith.mulf %21, %21 : vector<1x128xf32>
    %26 = arith.subf %24, %25 : vector<1x128xf32>
    %c0_7 = arith.constant 0 : index
    %c0_8 = arith.constant 0 : index
    %27 = vector.load %arg2[%c0_7, %c0_8] : memref<1x128xf32, #tpu.memory_space<vmem>>, vector<1x128xf32>
    %cst_9 = arith.constant 9.99999974E-6 : f32
    %28 = vector.broadcast %cst_9 : f32 to vector<1x128xf32>
    %29 = arith.addf %26, %28 : vector<1x128xf32>
    %30 = math.rsqrt %29 : vector<1x128xf32>
    %31 = arith.mulf %27, %30 : vector<1x128xf32>
    %c0_10 = arith.constant 0 : index
    %c0_11 = arith.constant 0 : index
    %32 = vector.load %arg3[%c0_10, %c0_11] : memref<1x128xf32, #tpu.memory_space<vmem>>, vector<1x128xf32>
    %33 = arith.mulf %21, %31 : vector<1x128xf32>
    %34 = arith.subf %32, %33 : vector<1x128xf32>
    %35 = vector.broadcast %31 : vector<1x128xf32> to vector<16x128xf32>
    %36 = arith.mulf %2, %35 : vector<16x128xf32>
    %37 = vector.broadcast %34 : vector<1x128xf32> to vector<16x128xf32>
    %38 = arith.addf %36, %37 : vector<16x128xf32>
    %cst_12 = arith.constant 0.000000e+00 : f32
    %39 = vector.broadcast %cst_12 : f32 to vector<16x128xf32>
    %40 = arith.maximumf %38, %39 : vector<16x128xf32>
    %41 = arith.truncf %40 : vector<16x128xf32> to vector<16x128xbf16>
    %cst_13 = arith.constant 0.000000e+00 : bf16
    %42 = vector.broadcast %cst_13 : bf16 to vector<1x128xbf16>
    %43 = tpu.concatenate %42, %41, %42 in 0 : vector<1x128xbf16>, vector<16x128xbf16>, vector<1x128xbf16> -> vector<18x128xbf16>
    %44 = vector.extract_strided_slice %43 {offsets = [0, 0], sizes = [16, 128], strides = [1, 1]} : vector<18x128xbf16> to vector<16x128xbf16>
    %45 = vector.extract_strided_slice %43 {offsets = [1, 0], sizes = [16, 128], strides = [1, 1]} : vector<18x128xbf16> to vector<16x128xbf16>
    %46 = vector.extract_strided_slice %43 {offsets = [2, 0], sizes = [16, 128], strides = [1, 1]} : vector<18x128xbf16> to vector<16x128xbf16>
    %47 = tpu.concatenate %44, %45, %46 in 1 : vector<16x128xbf16>, vector<16x128xbf16>, vector<16x128xbf16> -> vector<16x384xbf16>
    %c0_14 = arith.constant 0 : index
    %c0_15 = arith.constant 0 : index
    %48 = vector.load %arg4[%c0_14, %c0_15] : memref<384x128xbf16, #tpu.memory_space<vmem>>, vector<384x128xbf16>
    %cst_16 = arith.constant dense<0.000000e+00> : vector<16x128xf32>
    %49 = tpu.matmul %47, %48, %cst_16 {dimension_numbers = #tpu.dot_dimension_numbers<[1], [0], [0], [1], [0, 0, 1, 1], [], []>} : vector<16x384xbf16>, vector<384x128xbf16>, vector<16x128xf32> -> vector<16x128xf32>
    %cst_17 = arith.constant dense<0.000000e+00> : vector<128xf32>
    %50 = vector.multi_reduction <add>, %49, %cst_17 [0] : vector<16x128xf32> to vector<128xf32>
    %51 = vector.shape_cast %50 : vector<128xf32> to vector<1x128xf32>
    %52 = arith.mulf %49, %49 : vector<16x128xf32>
    %cst_18 = arith.constant dense<0.000000e+00> : vector<128xf32>
    %53 = vector.multi_reduction <add>, %52, %cst_18 [0] : vector<16x128xf32> to vector<128xf32>
    %54 = vector.shape_cast %53 : vector<128xf32> to vector<1x128xf32>
    %55 = tpu.concatenate %51, %54 in 0 : vector<1x128xf32>, vector<1x128xf32> -> vector<2x128xf32>
    %c4_i32_19 = arith.constant 4 : i32
    %56 = tpu.dynamic_rotate %55 by %c4_i32_19 dim 1 : vector<2x128xf32>, i32 -> vector<2x128xf32>
    %57 = arith.addf %55, %56 : vector<2x128xf32>
    %c8_i32_20 = arith.constant 8 : i32
    %58 = tpu.dynamic_rotate %57 by %c8_i32_20 dim 1 : vector<2x128xf32>, i32 -> vector<2x128xf32>
    %59 = arith.addf %57, %58 : vector<2x128xf32>
    %c16_i32_21 = arith.constant 16 : i32
    %60 = tpu.dynamic_rotate %59 by %c16_i32_21 dim 1 : vector<2x128xf32>, i32 -> vector<2x128xf32>
    %61 = arith.addf %59, %60 : vector<2x128xf32>
    %c32_i32_22 = arith.constant 32 : i32
    %62 = tpu.dynamic_rotate %61 by %c32_i32_22 dim 1 : vector<2x128xf32>, i32 -> vector<2x128xf32>
    %63 = arith.addf %61, %62 : vector<2x128xf32>
    %c64_i32_23 = arith.constant 64 : i32
    %64 = tpu.dynamic_rotate %63 by %c64_i32_23 dim 1 : vector<2x128xf32>, i32 -> vector<2x128xf32>
    %65 = arith.addf %63, %64 : vector<2x128xf32>
    %66 = vector.extract_strided_slice %65 {offsets = [0, 0], sizes = [1, 128], strides = [1, 1]} : vector<2x128xf32> to vector<1x128xf32>
    %cst_24 = arith.constant 0.001953125 : f32
    %67 = vector.broadcast %cst_24 : f32 to vector<1x128xf32>
    %68 = arith.mulf %66, %67 : vector<1x128xf32>
    %69 = vector.extract_strided_slice %65 {offsets = [1, 0], sizes = [1, 128], strides = [1, 1]} : vector<2x128xf32> to vector<1x128xf32>
    %cst_25 = arith.constant 0.001953125 : f32
    %70 = vector.broadcast %cst_25 : f32 to vector<1x128xf32>
    %71 = arith.mulf %69, %70 : vector<1x128xf32>
    %72 = arith.mulf %68, %68 : vector<1x128xf32>
    %73 = arith.subf %71, %72 : vector<1x128xf32>
    %c0_26 = arith.constant 0 : index
    %c0_27 = arith.constant 0 : index
    %74 = vector.load %arg5[%c0_26, %c0_27] : memref<1x128xf32, #tpu.memory_space<vmem>>, vector<1x128xf32>
    %cst_28 = arith.constant 9.99999974E-6 : f32
    %75 = vector.broadcast %cst_28 : f32 to vector<1x128xf32>
    %76 = arith.addf %73, %75 : vector<1x128xf32>
    %77 = math.rsqrt %76 : vector<1x128xf32>
    %78 = arith.mulf %74, %77 : vector<1x128xf32>
    %c0_29 = arith.constant 0 : index
    %c0_30 = arith.constant 0 : index
    %79 = vector.load %arg6[%c0_29, %c0_30] : memref<1x128xf32, #tpu.memory_space<vmem>>, vector<1x128xf32>
    %80 = arith.mulf %68, %78 : vector<1x128xf32>
    %81 = arith.subf %79, %80 : vector<1x128xf32>
    %82 = vector.broadcast %78 : vector<1x128xf32> to vector<16x128xf32>
    %83 = arith.mulf %49, %82 : vector<16x128xf32>
    %84 = vector.broadcast %81 : vector<1x128xf32> to vector<16x128xf32>
    %85 = arith.addf %83, %84 : vector<16x128xf32>
    %c0_31 = arith.constant 0 : index
    %c0_32 = arith.constant 0 : index
    %86 = vector.load %arg7[%c0_31, %c0_32] : memref<16x128xf32, #tpu.memory_space<vmem>>, vector<16x128xf32>
    %87 = arith.addf %85, %86 : vector<16x128xf32>
    %cst_33 = arith.constant 0.000000e+00 : f32
    %88 = vector.broadcast %cst_33 : f32 to vector<16x128xf32>
    %89 = arith.maximumf %87, %88 : vector<16x128xf32>
    %c0_34 = arith.constant 0 : index
    %c0_35 = arith.constant 0 : index
    %90 = vector.load %arg8[%c0_34, %c0_35] : memref<16x128xf32, #tpu.memory_space<vmem>>, vector<16x128xf32>
    tpu.vector_store %arg8[%c0_34, %c0_35], %89 {strides = array<i32>} : memref<16x128xf32, #tpu.memory_space<vmem>>, vector<16x128xf32>,
    return
  }
}

</mosaic_0001>

<bundles_post_ra>
// kernel: tpu_custom_call.1
= control target key start
LH: loop header
LB: loop body
LE: loop exit
PB: predicated region body
PF: predicated region fallthrough
CT: control target
= control target key end

     0   :  { %13 = vsyncpa [#allocation3], 0  ;;  %s1369_s0 = inlined_call_operand.hbm [shape: bf16[16,384], index: 0, kind: input, shape index: {}]   ;;  %s1370_s1 = inlined_call_operand.hbm [shape: bf16[384,128], index: 1, kind: input, shape index: {}]   ;;  %s1371_s2 = inlined_call_operand.vmem [shape: f32[1,128], index: 2, kind: input, shape index: {}]   ;;  %s1372_s3 = inlined_call_operand.vmem [shape: f32[1,128], index: 3, kind: input, shape index: {}]   ;;  %s1373_s4 = inlined_call_operand.hbm [shape: bf16[384,128], index: 4, kind: input, shape index: {}]   ;;  %s1374_s5 = inlined_call_operand.vmem [shape: f32[1,128], index: 5, kind: input, shape index: {}]   ;;  %s1375_s6 = inlined_call_operand.vmem [shape: f32[1,128], index: 6, kind: input, shape index: {}]   ;;  %s1376_s7 = inlined_call_operand.vmem [shape: f32[16,128], index: 7, kind: input, shape index: {}]   ;;  %s1377_s8 = inlined_call_operand.hbm [shape: f32[16,128], index: 8, kind: output, shape index: {}]  }
   0x1   :  { %14 = vsyncpa [#allocation6], 0 }
   0x2   :  { %15 = vsyncpa [#allocation4], 0  ;;  %s1179_s27 = smov [#allocation5]   ;;  %s1085_s9 = scalar_lea.hbm %s1370_s1, 3072 }
   0x3   :  { %s33_s28 = sshll.u32 %s1179_s27, 4  ;;  %p1086_p0 = scmp.ne.s32.totalorder %s1370_s1, %s1085_s9  ;;  %s34_s28 = int_to_ptr.vmem [resolvable:$true] %s33_s28 }
   0x4   :  { %p1089_p1 = scmp.lt.u32.totalorder %s1085_s9, %s1370_s1 }
   0x6   :  { %p1091_p2 = pnand %p1089_p1, %p1086_p0 }
   0x8   :  { %1094 = shalt.err (!%p1091_p2)
}
   0x9   :  { %s1095_s14 = scalar_lea.vmem %s34_s28, 3072  ;;  %p1100_p4 = scmp.lt.s32.totalorder %s34_s28, %s34_s28 }
   0xa   :  { %p1096_p3 = scmp.ne.s32.totalorder %s34_s28, %s1095_s14  ;;  %p1101_p5 = scmp.lt.s32.totalorder %s1095_s14, %s1095_s14 }
   0xc   :  { %p1102_p6 = por %p1101_p5, %p1100_p4 }
   0xe   :  { %p1103_p7 = pnand %p1102_p6, %p1096_p3 }
  0x10   :  { %1106 = shalt.err (!%p1103_p7)
}
  0x11   :  { %s1180_s15 = smov 64   ;;  %s1181_s16 = smov 4  }
  0x12   :  { %39 = dma.hbm_to_vmem [thread:$0]  %s1370_s1, 3072, %s34_s28, [#allocation6], %s1180_s15, %s1180_s15, %s1181_s16  }
  0x13   :  { %s1182_s19 = smov [#allocation2]   ;;  %s1107_s23 = scalar_lea.hbm %s1369_s0, 384 }
  0x14   :  { %s21_s20 = sshll.u32 %s1182_s19, 4  ;;  %p1108_p8 = scmp.ne.s32.totalorder %s1369_s0, %s1107_s23  ;;  %s22_s20 = int_to_ptr.vmem [resolvable:$true] %s21_s20 }
  0x15   :  { %p1111_p9 = scmp.lt.u32.totalorder %s1107_s23, %s1369_s0 }
  0x17   :  { %p1113_p10 = pnand %p1111_p9, %p1108_p8 }
  0x19   :  { %1116 = shalt.err (!%p1113_p10)
}
  0x1a   :  { %s1117_s29 = scalar_lea.vmem %s22_s20, 384  ;;  %p1122_p12 = scmp.lt.s32.totalorder %s22_s20, %s22_s20 }
  0x1b   :  { %p1118_p11 = scmp.ne.s32.totalorder %s22_s20, %s1117_s29  ;;  %p1123_p13 = scmp.lt.s32.totalorder %s1117_s29, %s1117_s29 }
  0x1d   :  { %p1124_p0 = por %p1123_p13, %p1122_p12 }
  0x1f   :  { %p1125_p1 = pnand %p1124_p0, %p1118_p11 }
  0x21   :  { %1128 = shalt.err (!%p1125_p1)
}
  0x22   :  { %s1183_s1 = smov 192   ;;  %s1184_s28 = smov 12  }
  0x23   :  { %27 = dma.hbm_to_vmem [thread:$0]  %s1369_s0, 384, %s22_s20, [#allocation3], %s1183_s1, %s1183_s1, %s1184_s28  }
  0x24   :  { %s1185_s10 = smov [#allocation7]   ;;  %s1129_s14 = scalar_lea.hbm %s1373_s4, 3072 }
  0x25   :  { %s49_s11 = sshll.u32 %s1185_s10, 4  ;;  %p1130_p2 = scmp.ne.s32.totalorder %s1373_s4, %s1129_s14  ;;  %s50_s11 = int_to_ptr.vmem [resolvable:$true] %s49_s11 }
  0x26   :  { %p1133_p3 = scmp.lt.u32.totalorder %s1129_s14, %s1373_s4 }
  0x28   :  { %p1135_p4 = pnand %p1133_p3, %p1130_p2 }
  0x2a   :  { %1138 = shalt.err (!%p1135_p4)
}
  0x2b   :  { %s1139_s22 = scalar_lea.vmem %s50_s11, 3072  ;;  %p1144_p6 = scmp.lt.s32.totalorder %s50_s11, %s50_s11 }
  0x2c   :  { %p1140_p5 = scmp.ne.s32.totalorder %s50_s11, %s1139_s22  ;;  %p1145_p7 = scmp.lt.s32.totalorder %s1139_s22, %s1139_s22 }
  0x2e   :  { %p1146_p8 = por %p1145_p7, %p1144_p6 }
  0x30   :  { %p1147_p9 = pnand %p1146_p8, %p1140_p5 }
  0x32   :  { %1150 = shalt.err (!%p1147_p9)
}
  0x33   :  { %55 = dma.hbm_to_vmem [thread:$0]  %s1373_s4, 3072, %s50_s11, [#allocation6], %s1180_s15, %s1180_s15, %s1181_s16  }
  0x34   :  { %1173 = dma.done.wait [#allocation3], 384  }
  0x35   :  { %1174 = vsyncadd [#allocation3], 4294966912 }
  0x36   :  { %1175 = dma.done.wait [#allocation6], 6144  }
  0x37   :  { %1176 = vsyncadd [#allocation6], 4294961152  ;;  %v1186_v0 = vmov 0.0   ;;  %vm1187_vm0 = vmmov 0   ;;  %v1029_v1 = vld [vmem:[#allocation5 + $0x40] sm:$0xff]   ;;  %v1032_v4 = vld [vmem:[#allocation5 + $0x48] sm:$0xff]  }
  0x38   :  { %974 = vmatprep.subr.bf16.mxu1 %v1186_v0  ;;  %990 = vmatprep.mubr.msk.bf16.mxu1 %vm1187_vm0, %v1186_v0  ;;  %v1030_v2 = vld [vmem:[#allocation5] sm:$0xff]   ;;  %v1033_v5 = vld [vmem:[#allocation5 + $0x8] sm:$0xff]   ;;  %v1035_v7 = vld [vmem:[#allocation5 + $0x50] sm:$0xff]   ;;  %vm382_vm1 = vcmask 1040384   ;;  %s1188_s4 = smov 8   ;;  %s1189_s23 = smov 16  }
  0x39   :  { %912 = vmatprep.subr.bf16.mxu0 %v1029_v1  ;;  %v1031_v3 = vld [vmem:[#allocation5 + $0x80] sm:$0xff]   ;;  %v1034_v6 = vld [vmem:[#allocation5 + $0x88] sm:$0xff]   ;;  %v1036_v8 = vld [vmem:[#allocation5 + $0x10] sm:$0xff]   ;;  %s1190_s24 = smov 32   ;;  %vm458_vm2 = vsmask.f32 256 }
  0x3a   :  { %913 = vmatpush3.bf16.msra.mxu0 %v1030_v2  ;;  %975 = vmatpush3.bf16.msra.mxu1 %v1031_v3  ;;  %v1037_v9 = vld [vmem:[#allocation5 + $0x90] sm:$0xff]   ;;  %v1038_v10 = vld [vmem:[#allocation5 + $0x58] sm:$0xff]   ;;  %v1041_v13 = vld [vmem:[#allocation5 + $0x60] sm:$0xff]   ;;  %vm478_vm4 = vcmask 1046528   ;;  %vm462_vm5 = vsmask.f32 7424 }
  0x3b   :  { %914 = vmatprep.subr.bf16.mxu0 %v1032_v4  ;;  %976 = vmatprep.subr.bf16.mxu1 %v1186_v0  ;;  %v1039_v11 = vld [vmem:[#allocation5 + $0x18] sm:$0xff]   ;;  %v1042_v14 = vld [vmem:[#allocation5 + $0x20] sm:$0xff]   ;;  %v1044_v16 = vld [vmem:[#allocation5 + $0x68] sm:$0xff]   ;;  %s1192_s9 = smov [#allocation8]  }
  0x3c   :  { %v1040_v12 = vld [vmem:[#allocation5 + $0x98] sm:$0xff]   ;;  %v1043_v15 = vld [vmem:[#allocation5 + $0xa0] sm:$0xff]   ;;  %v1045_v17 = vld [vmem:[#allocation5 + $0x28] sm:$0xff]  }
  0x3d   :  { %v1046_v18 = vld [vmem:[#allocation5 + $0xa8] sm:$0xff]   ;;  %v1047_v19 = vld [vmem:[#allocation5 + $0x70] sm:$0xff]   ;;  %v1050_v22 = vld [vmem:[#allocation5 + $0x78] sm:$0xff]  }
  0x3e   :  { %915 = vmatpush3.bf16.msra.mxu0 %v1033_v5  ;;  %977 = vmatpush3.bf16.msra.mxu1 %v1034_v6  ;;  %v1048_v20 = vld [vmem:[#allocation5 + $0x30] sm:$0xff]   ;;  %v1051_v23 = vld [vmem:[#allocation5 + $0x38] sm:$0xff]   ;;  %v1057_v2 = vld [vmem:[#allocation7 + $0x80] sm:$0xff]  }
  0x3f   :  { %916 = vmatprep.subr.bf16.mxu0 %v1035_v7  ;;  %978 = vmatprep.subr.bf16.mxu1 %v1186_v0  ;;  %v1049_v21 = vld [vmem:[#allocation5 + $0xb0] sm:$0xff]   ;;  %v1055_v24 = vld [vmem:[#allocation2 + $0x4] ss:$12 sps:$4 sm:$0xff]   ;;  %v1058_v3 = vld [vmem:[#allocation7 + $0x40] sm:$0xff]  }
  0x40   :  { %v1052_v25 = vld [vmem:[#allocation5 + $0xb8] sm:$0xff]   ;;  %316 = vmatprep.mubr.bf16.mxu0 %v1055_v24  ;;  %v1053_v26 = vld [vmem:[#allocation2] ss:$12 sps:$4 sm:$0xff]   ;;  %v1060_v5 = vld [vmem:[#allocation7] sm:$0xff]  }
  0x41   :  { %v1056_v27 = vld [vmem:[#allocation2 + $0x8] ss:$12 sps:$4 sm:$0xff]   ;;  %v1059_v4 = vld [vmem:[#allocation7 + $0x88] sm:$0xff]   ;;  %vm459_vm3 = vmand %vm382_vm1, %vm458_vm2 }
  0x42   :  { %917 = vmatpush3.bf16.msra.mxu0 %v1036_v8  ;;  %979 = vmatpush3.bf16.msra.mxu1 %v1037_v9  ;;  %v1061_v6 = vld [vmem:[#allocation7 + $0x48] sm:$0xff]   ;;  %v1062_v7 = vld [vmem:[#allocation7 + $0x90] sm:$0xff]   ;;  %v1079_v24 = vld [vmem:[#allocation7 + $0x78] sm:$0xff]  }
  0x43   :  { %918 = vmatprep.subr.bf16.mxu0 %v1038_v10  ;;  %980 = vmatprep.subr.bf16.mxu1 %v1186_v0  ;;  %v1063_v8 = vld [vmem:[#allocation7 + $0x8] sm:$0xff]   ;;  %v1064_v9 = vld [vmem:[#allocation7 + $0x50] sm:$0xff]   ;;  %v1065_v10 = vld [vmem:[#allocation7 + $0x98] sm:$0xff]  }
  0x46   :  { %919 = vmatpush3.bf16.msra.mxu0 %v1039_v11  ;;  %981 = vmatpush3.bf16.msra.mxu1 %v1040_v12  ;;  %v1066_v11 = vld [vmem:[#allocation7 + $0x10] sm:$0xff]   ;;  %v1067_v12 = vld [vmem:[#allocation7 + $0x58] sm:$0xff]  }
  0x47   :  { %920 = vmatprep.subr.bf16.mxu0 %v1041_v13  ;;  %982 = vmatprep.subr.bf16.mxu1 %v1186_v0  ;;  %v1068_v13 = vld [vmem:[#allocation7 + $0xa0] sm:$0xff]  }
  0x4a   :  { %921 = vmatpush3.bf16.msra.mxu0 %v1042_v14  ;;  %983 = vmatpush3.bf16.msra.mxu1 %v1043_v15  ;;  %v1069_v14 = vld [vmem:[#allocation7 + $0x18] sm:$0xff]   ;;  %v1070_v15 = vld [vmem:[#allocation7 + $0x60] sm:$0xff]  }
  0x4b   :  { %922 = vmatprep.subr.bf16.mxu0 %v1044_v16  ;;  %984 = vmatprep.subr.bf16.mxu1 %v1186_v0  ;;  %v1071_v16 = vld [vmem:[#allocation7 + $0xa8] sm:$0xff]  }
  0x4e   :  { %923 = vmatpush3.bf16.msra.mxu0 %v1045_v17  ;;  %985 = vmatpush3.bf16.msra.mxu1 %v1046_v18  ;;  %v1072_v17 = vld [vmem:[#allocation7 + $0x20] sm:$0xff]   ;;  %v1073_v18 = vld [vmem:[#allocation7 + $0x68] sm:$0xff]  }
  0x4f   :  { %924 = vmatprep.subr.bf16.mxu0 %v1047_v19  ;;  %986 = vmatprep.subr.bf16.mxu1 %v1186_v0  ;;  %v1074_v19 = vld [vmem:[#allocation7 + $0xb0] sm:$0xff]  }
  0x52   :  { %925 = vmatpush3.bf16.msra.mxu0 %v1048_v20  ;;  %987 = vmatpush3.bf16.msra.mxu1 %v1049_v21  ;;  %v1075_v20 = vld [vmem:[#allocation7 + $0x28] sm:$0xff]   ;;  %v1076_v21 = vld [vmem:[#allocation7 + $0x70] sm:$0xff]  }
  0x53   :  { %926 = vmatprep.subr.bf16.mxu0 %v1050_v22  ;;  %988 = vmatprep.subr.bf16.mxu1 %v1186_v0  ;;  %v1077_v22 = vld [vmem:[#allocation7 + $0xb8] sm:$0xff]  }
  0x56   :  { %927 = vmatpush3.bf16.msra.mxu0 %v1051_v23  ;;  %989 = vmatpush3.bf16.msra.mxu1 %v1052_v25  ;;  %v1078_v23 = vld [vmem:[#allocation7 + $0x30] sm:$0xff]   ;;  %v1080_v25 = vld [vmem:[#allocation7 + $0x38] sm:$0xff]  }
  0x57   :  { %994 = vmatprep.subr.bf16.mxu1 %v1186_v0  ;;  %943 = vmatprep.subr.bf16.mxu0 %v1058_v3 }
  0x59   :  { %317 = vmatmul.mubr.bf16.vlgmr.msra.gmra.mrb[0].mxu0 %v1053_v26  ;;  %991 = vmatmul.mubr.bf16.vlgmr.msra.gmra.mrb[0].mxu1 %v1056_v27 }
  0x5a   :  { %1010 = vmatprep.mubr.msk.bf16.mxu1 %vm1187_vm0, %v1186_v0  ;;  %995 = vmatpush3.bf16.msra.mxu1 %v1057_v2 }
  0x5b   :  { %996 = vmatprep.subr.bf16.mxu1 %v1186_v0  ;;  %944 = vmatpush3.bf16.msra.mxu0 %v1060_v5 }
  0x5c   :  { %945 = vmatprep.subr.bf16.mxu0 %v1061_v6 }
  0x5e   :  { %997 = vmatpush3.bf16.msra.mxu1 %v1059_v4 }
  0x5f   :  { %998 = vmatprep.subr.bf16.mxu1 %v1186_v0  ;;  %946 = vmatpush3.bf16.msra.mxu0 %v1063_v8 }
  0x60   :  { %947 = vmatprep.subr.bf16.mxu0 %v1064_v9 }
  0x62   :  { %999 = vmatpush3.bf16.msra.mxu1 %v1062_v7 }
  0x63   :  { %1000 = vmatprep.subr.bf16.mxu1 %v1186_v0  ;;  %948 = vmatpush3.bf16.msra.mxu0 %v1066_v11 }
  0x64   :  { %949 = vmatprep.subr.bf16.mxu0 %v1067_v12 }
  0x66   :  { %1001 = vmatpush3.bf16.msra.mxu1 %v1065_v10 }
  0x67   :  { %1002 = vmatprep.subr.bf16.mxu1 %v1186_v0  ;;  %950 = vmatpush3.bf16.msra.mxu0 %v1069_v14 }
  0x68   :  { %951 = vmatprep.subr.bf16.mxu0 %v1070_v15 }
  0x6a   :  { %1003 = vmatpush3.bf16.msra.mxu1 %v1068_v13 }
  0x6b   :  { %1004 = vmatprep.subr.bf16.mxu1 %v1186_v0  ;;  %952 = vmatpush3.bf16.msra.mxu0 %v1072_v17 }
  0x6c   :  { %953 = vmatprep.subr.bf16.mxu0 %v1073_v18 }
  0x6e   :  { %1005 = vmatpush3.bf16.msra.mxu1 %v1071_v16 }
  0x6f   :  { %1006 = vmatprep.subr.bf16.mxu1 %v1186_v0  ;;  %954 = vmatpush3.bf16.msra.mxu0 %v1075_v20 }
  0x70   :  { %955 = vmatprep.subr.bf16.mxu0 %v1076_v21 }
  0x72   :  { %1007 = vmatpush3.bf16.msra.mxu1 %v1074_v19 }
  0x73   :  { %1008 = vmatprep.subr.bf16.mxu1 %v1186_v0  ;;  %956 = vmatpush3.bf16.msra.mxu0 %v1078_v23 }
  0x74   :  { %957 = vmatprep.subr.bf16.mxu0 %v1079_v24 }
  0x76   :  { %1009 = vmatpush3.bf16.msra.mxu1 %v1077_v22 }
  0x77   :  { %958 = vmatpush3.bf16.msra.mxu0 %v1080_v25 }
 0x12c   :  { %v928_v28 = vpop.f32.mrb[0].mxu0  ;;  %v359_v29 = vpop.f32.mrb[0].mxu1 }
 0x12d   :  { %v929_v30 = vpop.f32.mrb[1].mxu0  ;;  %v992_v32 = vpop.f32.mrb[1].mxu1 }
 0x12e   :  { %v930_v31 = vadd.f32 %v929_v30, %v928_v28  ;;  %v931_v33 = vpop.f32.mrb[2].mxu0  ;;  %v362_v34 = vpop.f32.mrb[2].mxu1 }
 0x12f   :  { %v932_v35 = vpop.f32.mrb[3].mxu0  ;;  %v993_v38 = vpop.f32.mrb[3].mxu1 }
 0x130   :  { %v1294_v36 = vadd.f32 %v930_v31, %v359_v29  ;;  %v933_v37 = vadd.f32 %v932_v35, %v931_v33  ;;  %v1191_v33 = vmov 1966171168   ;;  %v412_v35 = vlaneseq }
 0x132   :  { %v1296_v39 = vadd.f32 %v933_v37, %v362_v34  ;;  %v373_v40 = vmul.f32 %v1294_v36, %v1294_v36  ;;  %v410_v34 = vunpack.c.l.s4 %v1191_v33  ;;  %v413_v37 = vshrl.u32 %v412_v35, 7 }
 0x134   :  { %v366_v41 = vadd.f32 %v1296_v39, %v1294_v36  ;;  %v374_v42 = vmul.f32 %v1296_v39, %v1296_v39  ;;  %v411_v0 = vunpack.c.0.s8 %v410_v34 }
 0x136   :  { %v367_v43 = vrot.slane %v366_v41, 4  ;;  %v375_v44 = vadd.f32 %v374_v42, %v373_v40  ;;  %v1317_v38 = vsub.s32 %v411_v0, %v413_v37 }
 0x138   :  { %v368_v45 = vadd.f32 %v367_v43, %v366_v41  ;;  %v376_v46 = vrot.slane %v375_v44, 4  ;;  %v405_v43 = vld [vmem:[%s1371_s2] sm:$0x1] }
 0x13a   :  { %v369_v47 = vrot.slane %v368_v45, 2  ;;  %v377_v48 = vadd.f32 %v376_v46, %v375_v44  ;;  %v1323_v44 = vsub.s32 0, %v413_v37 }
 0x13c   :  { %v370_v49 = vadd.f32 %v369_v47, %v368_v45  ;;  %v378_v50 = vrot.slane %v377_v48, 2  ;;  %v426_v47 = vld [vmem:[%s1372_s3] sm:$0x1] }
 0x13e   :  { %v371_v51 = vrot.slane %v370_v49, 1  ;;  %v379_v52 = vadd.f32 %v378_v50, %v377_v48 }
 0x140   :  { %v380_v53 = vrot.slane %v379_v52, 1  ;;  %v372_v54 = vadd.f32 %v371_v51, %v370_v49 }
 0x142   :  { %v381_v55 = vadd.f32 %v380_v53, %v379_v52 }
 0x144   :  { %v383_v56 = vsel %vm382_vm1, %v372_v54, %v381_v55 }
 0x145   :  { %384 = vrot.lane.b32.xlu0 %v383_v56, %s1181_s16 }
 0x1b7   :  { %v385_v57 = vpop.permute.xlu0 %384 }
 0x1b8   :  { %v386_v58 = vadd.f32 %v385_v57, %v383_v56 }
 0x1ba   :  { %387 = vrot.lane.b32.xlu0 %v386_v58, %s1188_s4 }
 0x22c   :  { %v388_v59 = vpop.permute.xlu0 %387 }
 0x22d   :  { %v389_v60 = vadd.f32 %v388_v59, %v386_v58 }
 0x22f   :  { %390 = vrot.lane.b32.xlu1 %v389_v60, %s1189_s23 }
 0x2a1   :  { %v391_v61 = vpop.permute.xlu1 %390 }
 0x2a2   :  { %v392_v62 = vadd.f32 %v391_v61, %v389_v60 }
 0x2a4   :  { %393 = vrot.lane.b32.xlu1 %v392_v62, %s1190_s24 }
 0x316   :  { %v394_v63 = vpop.permute.xlu1 %393 }
 0x317   :  { %v395_v1 = vadd.f32 %v394_v63, %v392_v62 }
 0x319   :  { %396 = vrot.lane.b32.xlu0 %v395_v1, %s1180_s15 }
 0x38b   :  { %v397_v26 = vpop.permute.xlu0 %396 }
 0x38c   :  { %v398_v27 = vadd.f32 %v397_v26, %v395_v1 }
 0x38e   :  { %v399_v28 = vmul.f32 0.001953125, %v398_v27 }
 0x390   :  { %v400_v29 = vmul.f32 %v399_v28, %v399_v28 }
 0x392   :  { %v402_v30 = vrot.slane %v400_v29, 7 }
 0x394   :  { %v404_v31 = vsub.f32 %v399_v28, %v402_v30 }
 0x396   :  { %v406_v32 = vadd.f32 1e-05, %v404_v31 }
 0x398   :  { %1081 = vrsqrt.f32 %v406_v32 }
 0x3a2   :  { %v1082_v40 = vpop.eup %1081 }
 0x3a3   :  { %v415_v41 = vrot.slane %v1082_v40, %v1317_v38 }
 0x3a5   :  { %v416_v42 = vcombine.high %v415_v41, %v415_v41 }
 0x3a7   :  { %v423_v45 = vrot.slane %v416_v42, %v1317_v38 }
 0x3a9   :  { %v425_v46 = vmul.f32 %v423_v45, %v405_v43 }
 0x3ab   :  { %v427_v48 = vmul.f32 %v425_v46, %v399_v28  ;;  %v433_v49 = vrot.slane %v425_v46, %v1323_v44 }
 0x3ad   :  { %v428_v50 = vsub.f32 %v426_v47, %v427_v48  ;;  %v435_v51 = vmul.f32 %v433_v49, %v1294_v36  ;;  %v436_v52 = vmul.f32 %v433_v49, %v1296_v39 }
 0x3af   :  { %v441_v53 = vrot.slane %v428_v50, %v1323_v44 }
 0x3b1   :  { %v443_v54 = vadd.f32 %v441_v53, %v435_v51  ;;  %v444_v55 = vadd.f32 %v441_v53, %v436_v52 }
 0x3b3   :  { %v445_v56 = vmax.f32 %v443_v54, 0.0  ;;  %v446_v57 = vmax.f32 %v444_v55, 0.0 }
 0x3b5   :  { %v447_v58 = vpack.c.bf16 %v446_v57, %v445_v56 }
 0x3b7   :  { %v449_v59 = vshrl.u32 %v447_v58, 16  ;;  %v452_v61 = vshll.u32 %v447_v58, 16 }
 0x3b9   :  { %v451_v60 = vrot.slane %v449_v59, 7 }
 0x3bb   :  { %v454_v62 = vor.u32 %v452_v61, %v451_v60  ;;  %v461_v63 = vsel %vm459_vm3, %v451_v60, 0  ;;  %v795_v60 = vld [vmem:[%s1374_s5] sm:$0x1] }
 0x3bc   :  { %v480_v2 = vrot.slane %v461_v63, 1  ;;  %v471_v3 = vshll.u32 %v461_v63, 16  ;;  %v816_v63 = vld [vmem:[%s1375_s6] sm:$0x1]  ;;  %s848_s6 = sshll.u32 %s1192_s9, 4  ;;  %s849_s6 = int_to_ptr.vmem [resolvable:$true] %s848_s6 }
 0x3bd   :  { %v460_v1 = vsel %vm459_vm3, 0, %v454_v62  ;;  %s1151_s10 = scalar_lea.vmem %s849_s6, 256  ;;  %p1156_p11 = scmp.lt.s32.totalorder %s849_s6, %s849_s6 }
 0x3be   :  { %v479_v36 = vrot.slane %v460_v1, 1  ;;  %v466_v39 = vshll.u32 %v460_v1, 16  ;;  %v464_v5 = vshrl.u32 %v460_v1, 16  ;;  %v473_v8 = vrot.slane %v471_v3, 1  ;;  %p1152_p10 = scmp.ne.s32.totalorder %s849_s6, %s1151_s10  ;;  %p1157_p12 = scmp.lt.s32.totalorder %s1151_s10, %s1151_s10 }
 0x3c0   :  { %v481_v4 = vsel %vm478_vm4, %v479_v36, %v480_v2  ;;  %v468_v6 = vrot.slane %v466_v39, 1  ;;  %p1158_p13 = por %p1157_p12, %p1156_p11 }
 0x3c1   :  { %1011 = vmatmul.mubr.bf16.vlgmr.msra.gmra.mrb[4].mxu1 %v481_v4 }
 0x3c2   :  { %v469_v7 = vor.u32 %v468_v6, %v464_v5  ;;  %v835_v5 = vld [vmem:[%s1376_s7] sm:$0xff]  ;;  %p1159_p0 = pnand %p1158_p13, %p1152_p10 }
 0x3c4   :  { %v474_v9 = vsel %vm462_vm5, %v469_v7, %v473_v8 }
 0x3c5   :  { %707 = vmatprep.mubr.bf16.mxu0 %v474_v9 }
 0x3c6   :  { %708 = vmatmul.mubr.bf16.vlgmr.msra.gmra.mrb[4].mxu0 %v460_v1 }
 0x494   :  { %v750_v10 = vpop.f32.mrb[4].mxu1 }
 0x495   :  { %v1012_v11 = vpop.f32.mrb[5].mxu1 }
 0x496   :  { %v753_v12 = vpop.f32.mrb[6].mxu1 }
 0x497   :  { %v1013_v13 = vpop.f32.mrb[7].mxu1 }
 0x499   :  { %v959_v14 = vpop.f32.mrb[4].mxu0 }
 0x49a   :  { %v960_v15 = vpop.f32.mrb[5].mxu0 }
 0x49b   :  { %v961_v16 = vadd.f32 %v960_v15, %v959_v14  ;;  %v962_v17 = vpop.f32.mrb[6].mxu0 }
 0x49c   :  { %v963_v18 = vpop.f32.mrb[7].mxu0 }
 0x49d   :  { %v751_v19 = vadd.f32 %v961_v16, %v750_v10  ;;  %v964_v20 = vadd.f32 %v963_v18, %v962_v17 }
 0x49f   :  { %v754_v21 = vadd.f32 %v964_v20, %v753_v12  ;;  %v764_v22 = vmul.f32 %v751_v19, %v751_v19 }
 0x4a1   :  { %v757_v23 = vadd.f32 %v754_v21, %v751_v19  ;;  %v765_v24 = vmul.f32 %v754_v21, %v754_v21 }
 0x4a3   :  { %v758_v25 = vrot.slane %v757_v23, 4  ;;  %v766_v26 = vadd.f32 %v765_v24, %v764_v22 }
 0x4a5   :  { %v759_v27 = vadd.f32 %v758_v25, %v757_v23  ;;  %v767_v28 = vrot.slane %v766_v26, 4 }
 0x4a7   :  { %v760_v29 = vrot.slane %v759_v27, 2  ;;  %v768_v30 = vadd.f32 %v767_v28, %v766_v26 }
 0x4a9   :  { %v761_v31 = vadd.f32 %v760_v29, %v759_v27  ;;  %v769_v32 = vrot.slane %v768_v30, 2 }
 0x4ab   :  { %v762_v33 = vrot.slane %v761_v31, 1  ;;  %v770_v34 = vadd.f32 %v769_v32, %v768_v30 }
 0x4ad   :  { %v771_v35 = vrot.slane %v770_v34, 1  ;;  %v763_v0 = vadd.f32 %v762_v33, %v761_v31 }
 0x4af   :  { %v772_v37 = vadd.f32 %v771_v35, %v770_v34 }
 0x4b1   :  { %v773_v40 = vsel %vm382_vm1, %v763_v0, %v772_v37 }
 0x4b2   :  { %774 = vrot.lane.b32.xlu1 %v773_v40, %s1181_s16 }
 0x524   :  { %v775_v41 = vpop.permute.xlu1 %774 }
 0x525   :  { %v776_v42 = vadd.f32 %v775_v41, %v773_v40 }
 0x527   :  { %777 = vrot.lane.b32.xlu0 %v776_v42, %s1188_s4 }
 0x599   :  { %v778_v43 = vpop.permute.xlu0 %777 }
 0x59a   :  { %v779_v45 = vadd.f32 %v778_v43, %v776_v42 }
 0x59c   :  { %780 = vrot.lane.b32.xlu1 %v779_v45, %s1189_s23 }
 0x60e   :  { %v781_v46 = vpop.permute.xlu1 %780 }
 0x60f   :  { %v782_v47 = vadd.f32 %v781_v46, %v779_v45 }
 0x611   :  { %783 = vrot.lane.b32.xlu0 %v782_v47, %s1190_s24 }
 0x683   :  { %v784_v48 = vpop.permute.xlu0 %783 }
 0x684   :  { %v785_v49 = vadd.f32 %v784_v48, %v782_v47 }
 0x686   :  { %786 = vrot.lane.b32.xlu1 %v785_v49, %s1180_s15 }
 0x6f8   :  { %v787_v50 = vpop.permute.xlu1 %786 }
 0x6f9   :  { %v788_v51 = vadd.f32 %v787_v50, %v785_v49 }
 0x6fb   :  { %v789_v52 = vmul.f32 0.001953125, %v788_v51 }
 0x6fd   :  { %v790_v53 = vmul.f32 %v789_v52, %v789_v52 }
 0x6ff   :  { %v792_v54 = vrot.slane %v790_v53, 7 }
 0x701   :  { %v794_v55 = vsub.f32 %v789_v52, %v792_v54 }
 0x703   :  { %v796_v56 = vadd.f32 1e-05, %v794_v55 }
 0x705   :  { %1083 = vrsqrt.f32 %v796_v56 }
 0x70f   :  { %v1084_v57 = vpop.eup %1083 }
 0x710   :  { %v805_v58 = vrot.slane %v1084_v57, %v1317_v38 }
 0x712   :  { %v806_v59 = vcombine.high %v805_v58, %v805_v58 }
 0x714   :  { %v813_v61 = vrot.slane %v806_v59, %v1317_v38  ;;  %v836_v38 = vld [vmem:[%s1376_s7 + $0x8] sm:$0xff] }
 0x716   :  { %v815_v62 = vmul.f32 %v813_v61, %v795_v60 }
 0x718   :  { %v817_v1 = vmul.f32 %v815_v62, %v789_v52  ;;  %v823_v36 = vrot.slane %v815_v62, %v1323_v44 }
 0x71a   :  { %v818_v2 = vsub.f32 %v816_v63, %v817_v1  ;;  %v825_v39 = vmul.f32 %v823_v36, %v751_v19  ;;  %v826_v3 = vmul.f32 %v823_v36, %v754_v21 }
 0x71c   :  { %v831_v4 = vrot.slane %v818_v2, %v1323_v44 }
 0x71e   :  { %v833_v6 = vadd.f32 %v831_v4, %v825_v39  ;;  %v834_v7 = vadd.f32 %v831_v4, %v826_v3 }
 0x720   :  { %v837_v8 = vadd.f32 %v835_v5, %v833_v6  ;;  %v838_v9 = vadd.f32 %v836_v38, %v834_v7 }
 0x722   :  { %v839_v10 = vmax.f32 %v837_v8, 0.0  ;;  %v840_v11 = vmax.f32 %v838_v9, 0.0 }
 0x724   :  { %841 = vst [vmem:[#allocation8] sm:$0xff] %v839_v10  ;;  %842 = vst [vmem:[#allocation8 + $0x8] sm:$0xff] %v840_v11 }
 0x725   :  { %1162 = shalt.err (!%p1159_p0)
}
 0x726   :  { %s1163_s12 = scalar_lea.hbm %s1377_s8, 256 }
 0x727   :  { %p1164_p1 = scmp.ne.s32.totalorder %s1377_s8, %s1163_s12  ;;  %p1167_p2 = scmp.lt.u32.totalorder %s1163_s12, %s1377_s8 }
 0x729   :  { %p1169_p3 = pnand %p1167_p2, %p1164_p1 }
 0x72b   :  { %1172 = shalt.err (!%p1169_p3)
}
 0x72c   :  { %s1193_s19 = smov 128  }
 0x72d   :  { %854 = dma.vmem_to_hbm [thread:$0]  %s849_s6, 256, %s1377_s8, [#allocation4], %s1193_s19, %s1193_s19, %s1188_s4  }
 0x72e   :  { %1177 = dma.done.wait [#allocation4], 256  }
 0x72f   :  { %1178 = vsyncadd [#allocation4], 4294967040 }
 0x730   :  { %858 = vsyncpa [#allocation3], 1 }
 0x731   :  { %859 = vsyncpa [#allocation6], 1 }
 0x732   :  { %860 = vsyncpa [#allocation4], 1 }

</bundles_post_ra>
